<compile_context>
chip_gen: v7x
topology: tpu7x:2x2x1
jax: 0.10.0
libtpu: 0.0.40
codegen_flags: <defaults>
</compile_context>

<pallas_src>
import jax
import jax.numpy as jnp
from jax.experimental import pallas as pl
from jax.experimental.pallas import tpu as pltpu

DIM_Y = 3
LANE = 128
SUBLANE = 8
MAX_R = 2048  # rows of 128 lanes per grid step (1 MiB in / 2 MiB out, f32)


def swiss_roll_kernel(u_ref, y_ref):
    # u_ref: (R, 128) dense plane of u values.
    # y_ref: (2, R, 128) -> row 0 = t*cos(t), row 1 = t*sin(t).
    t = 1.5 * jnp.pi * (1.0 + 2.0 * u_ref[...])
    y_ref[0, :, :] = t * jnp.cos(t)
    y_ref[1, :, :] = t * jnp.sin(t)


def swiss_roll_forward(x):
    """WrapperModule.forward(x) == SwissRoll(dim_y=3)(x).  x: (N, 2) -> (N, 3)."""
    n, two = x.shape
    assert two == 2

    xf = x.astype(jnp.float32)
    u = xf[:, 0]  # (N,)
    h = xf[:, 1]  # (N,)  pure passthrough -> handled in the wrapper, not the kernel

    # Fold the batch into (rows, 128) dense planes.
    total_rows = pl.cdiv(n, LANE)
    # Block rows R: multiple of 8 (sublane), capped at MAX_R.
    r = min(MAX_R, pl.cdiv(total_rows, SUBLANE) * SUBLANE)
    rows_pad = pl.cdiv(total_rows, r) * r
    n_pad = rows_pad * LANE

    u_p = jnp.pad(u, (0, n_pad - n)).reshape(rows_pad, LANE)  # free reshape

    grid = (rows_pad // r,)
    y2 = pl.pallas_call(
        swiss_roll_kernel,
        out_shape=jax.ShapeDtypeStruct((2, rows_pad, LANE), jnp.float32),
        grid=grid,
        in_specs=[pl.BlockSpec((r, LANE), lambda i: (i, 0))],
        out_specs=pl.BlockSpec((2, r, LANE), lambda i: (0, i, 0)),
        compiler_params=pltpu.CompilerParams(
            dimension_semantics=("parallel",)),
    )(u_p)

    y2 = y2.reshape(2, n_pad)[:, :n]  # (2, N) valid columns
    # Assemble (N, 3) = [t*cos t, h, t*sin t]; layout plumbing stays in XLA.
    return jnp.stack([y2[0], h, y2[1]], axis=1)


def swiss_roll_reference(x):
    u = x[:, 0:1]
    h = x[:, 1:2]
    t = 1.5 * jnp.pi * (1.0 + 2.0 * u)
    return jnp.concatenate([t * jnp.cos(t), h, t * jnp.sin(t)], axis=1)


if __name__ == "__main__":
    key = jax.random.PRNGKey(0)
    k_u, k_h = jax.random.split(key)
    N = 200  # not a multiple of 128 -> exercises padding + multi-row path
    u = jax.random.uniform(k_u, (N, 1), dtype=jnp.float32)            # [0, 1)
    h = 21.0 * jax.random.uniform(k_h, (N, 1), dtype=jnp.float32)     # height
    x = jnp.concatenate([u, h], axis=1)                               # (N, 2)

    y = swiss_roll_forward(x)
    y = jax.block_until_ready(y)

    y_ref = swiss_roll_reference(x)
    assert y.shape == (N, DIM_Y)
    assert jnp.allclose(y, y_ref, atol=1e-5, rtol=1e-5)

    print("KERNEL_OK")
</pallas_src>

<mosaic_0001>
module attributes {stable_mosaic.version = 11 : i64} {
  func.func @swiss_roll_kernel(%arg0: i32, %arg1: memref<8x128xf32, #tpu.memory_space<vmem>>, %arg2: memref<2x8x128xf32, #tpu.memory_space<vmem>>) attributes {dimension_semantics = [#tpu.dimension_semantics<parallel>], iteration_bounds = array<i64: 1>, scalar_prefetch = 0 : i64, scratch_operands = 0 : i64, tpu.core_type = #tpu.core_type<tc>, window_params = [{transform_indices = @transform_0, window_bounds = array<i64: 8, 128>}, {transform_indices = @transform_1, window_bounds = array<i64: 2, 8, 128>}]} {
    %c0 = arith.constant 0 : index
    %c0_0 = arith.constant 0 : index
    %0 = vector.load %arg1[%c0, %c0_0] : memref<8x128xf32, #tpu.memory_space<vmem>>, vector<8x128xf32>
    %cst = arith.constant 2.000000e+00 : f32
    %1 = vector.broadcast %cst : f32 to vector<8x128xf32>
    %2 = arith.mulf %1, %0 : vector<8x128xf32>
    %cst_1 = arith.constant 1.000000e+00 : f32
    %3 = vector.broadcast %cst_1 : f32 to vector<8x128xf32>
    %4 = arith.addf %3, %2 : vector<8x128xf32>
    %cst_2 = arith.constant 4.71238899 : f32
    %5 = vector.broadcast %cst_2 : f32 to vector<8x128xf32>
    %6 = arith.mulf %5, %4 : vector<8x128xf32>
    %7 = math.cos %6 : vector<8x128xf32>
    %8 = arith.mulf %6, %7 : vector<8x128xf32>
    %c0_3 = arith.constant 0 : index
    %c0_4 = arith.constant 0 : index
    %c0_5 = arith.constant 0 : index
    %9 = vector.load %arg2[%c0_3, %c0_4, %c0_5] : memref<2x8x128xf32, #tpu.memory_space<vmem>>, vector<1x8x128xf32>
    %10 = vector.shape_cast %9 : vector<1x8x128xf32> to vector<8x128xf32>
    %11 = vector.shape_cast %8 : vector<8x128xf32> to vector<1x8x128xf32>
    tpu.vector_store %arg2[%c0_3, %c0_4, %c0_5], %11 {strides = array<i32>} : memref<2x8x128xf32, #tpu.memory_space<vmem>>, vector<1x8x128xf32>,
    %12 = math.sin %6 : vector<8x128xf32>
    %13 = arith.mulf %6, %12 : vector<8x128xf32>
    %c1 = arith.constant 1 : index
    %c0_6 = arith.constant 0 : index
    %c0_7 = arith.constant 0 : index
    %14 = vector.load %arg2[%c1, %c0_6, %c0_7] : memref<2x8x128xf32, #tpu.memory_space<vmem>>, vector<1x8x128xf32>
    %15 = vector.shape_cast %14 : vector<1x8x128xf32> to vector<8x128xf32>
    %16 = vector.shape_cast %13 : vector<8x128xf32> to vector<1x8x128xf32>
    tpu.vector_store %arg2[%c1, %c0_6, %c0_7], %16 {strides = array<i32>} : memref<2x8x128xf32, #tpu.memory_space<vmem>>, vector<1x8x128xf32>,
    return
  }
  func.func @transform_0(%arg0: i32) -> (i32, i32) {
    %c0_i32 = arith.constant 0 : i32
    %c0_i32_0 = arith.constant 0 : i32
    return %arg0, %c0_i32 : i32, i32
  }
  func.func @transform_1(%arg0: i32) -> (i32, i32, i32) {
    %c0_i32 = arith.constant 0 : i32
    %c0_i32_0 = arith.constant 0 : i32
    %c0_i32_1 = arith.constant 0 : i32
    return %c0_i32, %arg0, %c0_i32_0 : i32, i32, i32
  }
}

</mosaic_0001>

<bundles_post_ra>
// kernel: tpu_custom_call.1
= control target key start
LH: loop header
LB: loop body
LE: loop exit
PB: predicated region body
PF: predicated region fallthrough
CT: control target
= control target key end

     0   :  { %6 = vsyncpa [#allocation3], 0  ;;  %s395_s0 = inlined_call_operand.hbm [shape: f32[8,128], index: 0, kind: input, shape index: {}]   ;;  %s396_s1 = inlined_call_operand.hbm [shape: f32[2,8,128], index: 1, kind: output, shape index: {}]  }
   0x1   :  { %7 = vsyncpa [#allocation4], 0  ;;  %s328_s6 = smov [#allocation2]   ;;  %s280_s10 = scalar_lea.hbm %s395_s0, 128 }
   0x2   :  { %s14_s7 = sshll.u32 %s328_s6, 4  ;;  %p281_p0 = scmp.ne.s32.totalorder %s395_s0, %s280_s10  ;;  %s15_s7 = int_to_ptr.vmem [resolvable:$true] %s14_s7 }
   0x3   :  { %p284_p1 = scmp.lt.u32.totalorder %s280_s10, %s395_s0 }
   0x5   :  { %p286_p2 = pnand %p284_p1, %p281_p0 }
   0x7   :  { %289 = shalt.err (!%p286_p2)
}
   0x8   :  { %s290_s15 = scalar_lea.vmem %s15_s7, 128  ;;  %p295_p4 = scmp.lt.s32.totalorder %s15_s7, %s15_s7 }
   0x9   :  { %p291_p3 = scmp.ne.s32.totalorder %s15_s7, %s290_s15  ;;  %p296_p5 = scmp.lt.s32.totalorder %s290_s15, %s290_s15 }
   0xb   :  { %p297_p6 = por %p296_p5, %p295_p4 }
   0xd   :  { %p298_p7 = pnand %p297_p6, %p291_p3 }
   0xf   :  { %301 = shalt.err (!%p298_p7)
}
  0x10   :  { %17 = dma.hbm_to_vmem [thread:$0]  %s395_s0, 128, %s15_s7, [#allocation3]  }
  0x11   :  { %324 = dma.done.wait [#allocation3], 128  }
  0x12   :  { %325 = vsyncadd [#allocation3], 4294967168  ;;  %v21_v0 = vld [vmem:[#allocation2] sm:$0xff]  ;;  %v329_v15 = vmov 683565275   ;;  %s335_s0 = smov [#allocation5]  }
  0x13   :  { %v22_v1 = vmul.f32 2.0, %v21_v0  ;;  %v330_v17 = vmov 2475754826   ;;  %v331_v19 = vmov 2131351028   ;;  %s242_s18 = sshll.u32 %s335_s0, 4  ;;  %s243_s18 = int_to_ptr.vmem [resolvable:$true] %s242_s18 }
  0x14   :  { %v332_v21 = vmov 2102212464   ;;  %v333_v23 = vmov 920167782   ;;  %v334_v30 = vmov 1326507024   ;;  %p307_p9 = scmp.lt.s32.totalorder %s243_s18, %s243_s18 }
  0x15   :  { %v23_v2 = vadd.f32 1.0, %v22_v1  ;;  %s302_s19 = scalar_lea.vmem %s243_s18, 256 }
  0x16   :  { %p303_p8 = scmp.ne.s32.totalorder %s243_s18, %s302_s19  ;;  %p308_p10 = scmp.lt.s32.totalorder %s302_s19, %s302_s19 }
  0x17   :  { %v360_v3 = vmul.f32 4.712389, %v23_v2 }
  0x18   :  { %p309_p11 = por %p308_p10, %p307_p9 }
  0x19   :  { %v28_v4 = vand.u32 2139095040, %v360_v3  ;;  %v25_v6 = vand.u32 2147483647, %v360_v3  ;;  %vm27_vm7 = vcmp.lt.s32.totalorder %v360_v3, 0  ;;  %vm117_vm15 = vweird.f32 %v360_v3 }
  0x1a   :  { %p310_p12 = pnand %p309_p11, %p303_p8 }
  0x1b   :  { %v29_v5 = vshrl.u32 %v28_v4, 23  ;;  %v32_v9 = vand.u32 8388607, %v25_v6  ;;  %vm26_vm8 = vcmp.le.f32.partialorder %v25_v6, 0.7853982 }
  0x1d   :  { %v254_v7 = vadd.s32 4294967169, %v29_v5  ;;  %v33_v12 = vor.u32 8388608, %v32_v9 }
  0x1f   :  { %v35_v8 = vadd.s32 1, %v254_v7  ;;  %v73_v32 = vshll.u32 %v33_v12, 8 }
  0x21   :  { %vm36_vm0 = vcmp.gt.s32.totalorder %v35_v8, 0 }
  0x22   :  { %v37_v10 = vsel %vm36_vm0, %v35_v8, 0 }
  0x23   :  { %v39_v11 = vand.u32 31, %v37_v10  ;;  %v38_v13 = vshrl.u32 %v37_v10, 5 }
  0x25   :  { %v40_v14 = vsub.s32 32, %v39_v11  ;;  %v42_v16 = vshll.u32 %v329_v15, %v39_v11  ;;  %v45_v18 = vshll.u32 %v330_v17, %v39_v11  ;;  %v48_v20 = vshll.u32 %v331_v19, %v39_v11 }
  0x26   :  { %v51_v22 = vshll.u32 %v332_v21, %v39_v11  ;;  %v54_v24 = vshll.u32 %v333_v23, %v39_v11  ;;  %vm57_vm1 = vcmp.lt.s32.totalorder %v38_v13, 1  ;;  %vm60_vm2 = vcmp.lt.s32.totalorder %v38_v13, 4 }
  0x27   :  { %v41_v25 = vshrl.u32 %v329_v15, %v40_v14  ;;  %v43_v26 = vshrl.u32 %v330_v17, %v40_v14  ;;  %v46_v27 = vshrl.u32 %v331_v19, %v40_v14  ;;  %v49_v28 = vshrl.u32 %v332_v21, %v40_v14 }
  0x28   :  { %v52_v29 = vshrl.u32 %v333_v23, %v40_v14  ;;  %v55_v31 = vshrl.u32 %v334_v30, %v40_v14  ;;  %vm58_vm3 = vcmp.lt.s32.totalorder %v38_v13, 2  ;;  %vm59_vm4 = vcmp.lt.s32.totalorder %v38_v13, 3 }
  0x29   :  { %v44_v33 = vor.u32 %v43_v26, %v42_v16  ;;  %v47_v34 = vor.u32 %v46_v27, %v45_v18  ;;  %v50_v35 = vor.u32 %v49_v28, %v48_v20 }
  0x2a   :  { %v53_v36 = vor.u32 %v52_v29, %v51_v22  ;;  %v56_v37 = vor.u32 %v55_v31, %v54_v24 }
  0x2b   :  { %v61_v38 = vsel %vm57_vm1, %v41_v25, %v44_v33  ;;  %v62_v39 = vsel %vm60_vm2, %v50_v35, 2102212464  ;;  %v65_v40 = vsel %vm57_vm1, %v44_v33, %v47_v34  ;;  %v69_v41 = vsel %vm57_vm1, %v47_v34, %v50_v35 }
  0x2c   :  { %v63_v42 = vsel %vm59_vm4, %v47_v34, %v62_v39  ;;  %v66_v43 = vsel %vm60_vm2, %v53_v36, 920167782  ;;  %v70_v44 = vsel %vm60_vm2, %v56_v37, 1326507024 }
  0x2d   :  { %v67_v45 = vsel %vm59_vm4, %v50_v35, %v66_v43  ;;  %v71_v46 = vsel %vm59_vm4, %v53_v36, %v70_v44  ;;  %v64_v47 = vsel %vm58_vm3, %v61_v38, %v63_v42 }
  0x2e   :  { %v68_v48 = vsel %vm58_vm3, %v65_v40, %v67_v45  ;;  %v72_v49 = vsel %vm58_vm3, %v69_v41, %v71_v46  ;;  %v80_v54 = vmul.u32 %v73_v32, %v64_v47 }
  0x2f   :  { %v366_v50 = vmul.u32.u64.low %v73_v32, %v72_v49  ;;  %v367_v51 = vmul.u32.u64.high %v73_v32, %v72_v49, %v366_v50  ;;  %v369_v52 = vmul.u32.u64.low %v73_v32, %v68_v48  ;;  %v370_v53 = vmul.u32.u64.high %v73_v32, %v68_v48, %v369_v52 }
  0x31   :  { %vm82_vm5 = vc.u32 %v367_v51, %v369_v52  ;;  %v83_v55 = vadd.s32 1, %v370_v53  ;;  %v81_v2 = vadd.s32 %v369_v52, %v367_v51 }
  0x33   :  { %v84_v56 = vsel %vm82_vm5, %v83_v55, %v370_v53 }
  0x34   :  { %v85_v57 = vadd.s32 %v84_v56, %v80_v54 }
  0x36   :  { %v86_v58 = vadd.s32 536870912, %v85_v57 }
  0x38   :  { %v87_v59 = vshrl.u32 %v86_v58, 30 }
  0x3a   :  { %v88_v60 = vshll.u32 %v87_v59, 30  ;;  %v111_v16 = vsub.s32 4, %v87_v59 }
  0x3c   :  { %v89_v61 = vsub.s32 %v85_v57, %v88_v60  ;;  %v112_v19 = vsel %vm27_vm7, %v111_v16, %v87_v59 }
  0x3d   :  { %v114_v22 = vsel %vm26_vm8, 0, %v112_v19 }
  0x3e   :  { %v91_v62 = vsub.s32 0, %v89_v61  ;;  %v223_v23 = vadd.s32 3, %v114_v22  ;;  %v118_v24 = vand.u32 3, %v114_v22 }
  0x40   :  { %v255_v63 = vmin.u32 %v91_v62, %v89_v61  ;;  %v224_v25 = vand.u32 3, %v223_v23  ;;  %vm123_vm9 = vcmp.eq.s32.totalorder %v118_v24, 2  ;;  %vm120_vm11 = vcmp.eq.s32.totalorder %v118_v24, 0 }
  0x41   :  { %vm119_vm13 = vcmp.lt.s32.totalorder %v118_v24, 2 }
  0x42   :  { %v93_v0 = vclz %v255_v63  ;;  %vm229_vm10 = vcmp.eq.s32.totalorder %v224_v25, 2  ;;  %vm226_vm12 = vcmp.eq.s32.totalorder %v224_v25, 0  ;;  %vm225_vm14 = vcmp.lt.s32.totalorder %v224_v25, 2 }
  0x44   :  { %v256_v1 = vadd.s32 4294967294, %v93_v0 }
  0x46   :  { %vm257_vm6 = vcmp.lt.s32.totalorder %v256_v1, 0 }
  0x47   :  { %v96_v4 = vsel %vm257_vm6, 0, %v256_v1 }
  0x48   :  { %v97_v5 = vsub.s32 32, %v96_v4  ;;  %v98_v7 = vshll.u32 %v89_v61, %v96_v4  ;;  %v101_v8 = vsub.s32 4294967266, %v96_v4 }
  0x4a   :  { %v99_v9 = vshrl.u32 %v81_v2, %v97_v5  ;;  %v102_v10 = vadd.s32 127, %v101_v8 }
  0x4c   :  { %v100_v11 = vor.u32 %v99_v9, %v98_v7  ;;  %v103_v12 = vshll.u32 %v102_v10, 23 }
  0x4e   :  { %v104_v13 = vor.u32 4788187, %v103_v12  ;;  %v107_v14 = vcvt.s32.f32 %v100_v11 }
  0x50   :  { %v105_v15 = vand.u32 2147483647, %v104_v13 }
  0x52   :  { %v108_v17 = vmul.f32 %v107_v14, %v105_v15 }
  0x54   :  { %v109_v18 = vxor.u32 2147483648, %v108_v17 }
  0x56   :  { %v110_v20 = vsel %vm27_vm7, %v109_v18, %v108_v17 }
  0x57   :  { %v113_v21 = vsel %vm26_vm8, %v360_v3, %v110_v20 }
  0x58   :  { %276 = vcosq.f32 %v113_v21 }
  0x59   :  { %278 = vsinq.f32 %v113_v21 }
  0x62   :  { %v277_v26 = vpop.eup %276 }
  0x63   :  { %v279_v27 = vpop.eup %278  ;;  %v124_v28 = vxor.u32 2147483648, %v277_v26 }
  0x64   :  { %v121_v6 = vxor.u32 2147483648, %v279_v27 }
  0x65   :  { %v125_v29 = vsel %vm123_vm9, %v124_v28, %v279_v27  ;;  %v231_v30 = vsel %vm229_vm10, %v124_v28, %v279_v27 }
  0x66   :  { %v122_v31 = vsel %vm120_vm11, %v277_v26, %v121_v6  ;;  %v228_v32 = vsel %vm226_vm12, %v277_v26, %v121_v6 }
  0x67   :  { %v126_v33 = vsel %vm119_vm13, %v122_v31, %v125_v29  ;;  %v232_v34 = vsel %vm225_vm14, %v228_v32, %v231_v30 }
  0x68   :  { %v127_v35 = vsel %vm117_vm15, nan, %v126_v33  ;;  %v233_v36 = vsel %vm117_vm15, nan, %v232_v34 }
  0x69   :  { %v128_v37 = vmul.f32 %v127_v35, %v360_v3  ;;  %v234_v38 = vmul.f32 %v233_v36, %v360_v3 }
  0x6b   :  { %129 = vst [vmem:[#allocation5] sm:$0xff] %v128_v37  ;;  %236 = vst [vmem:[#allocation5 + $0x8] sm:$0xff] %v234_v38 }
  0x6c   :  { %313 = shalt.err (!%p310_p12)
}
  0x6d   :  { %s314_s22 = scalar_lea.hbm %s396_s1, 256 }
  0x6e   :  { %p315_p13 = scmp.ne.s32.totalorder %s396_s1, %s314_s22  ;;  %p318_p0 = scmp.lt.u32.totalorder %s314_s22, %s396_s1 }
  0x70   :  { %p320_p1 = pnand %p318_p0, %p315_p13 }
  0x72   :  { %323 = shalt.err (!%p320_p1)
}
  0x73   :  { %s336_s27 = smov 128   ;;  %s337_s28 = smov 8  }
  0x74   :  { %248 = dma.vmem_to_hbm [thread:$0]  %s243_s18, 256, %s396_s1, [#allocation4], %s336_s27, %s336_s27, %s337_s28  }
  0x75   :  { %326 = dma.done.wait [#allocation4], 256  }
  0x76   :  { %327 = vsyncadd [#allocation4], 4294967040 }
  0x77   :  { %252 = vsyncpa [#allocation3], 1 }
  0x78   :  { %253 = vsyncpa [#allocation4], 1 }

</bundles_post_ra>
